<compile_context>
chip_gen: v5e
topology: v5e:2x2
jax: 0.10.0
libtpu: 0.0.40
codegen_flags: <defaults>
</compile_context>

<pallas_src>
import math

import jax
import jax.numpy as jnp
import numpy as np
from jax.experimental import pallas as pl
from jax.experimental.pallas import tpu as pltpu


def decoder_block_kernel(x_ref, skip_ref, u_ref, wx_ref, ws_ref, bias_ref, o_ref):
    """One batch tile; batch folded into the lane axis.

    x_ref    : (1, C_in,   Bt*L_in)       bf16
    skip_ref : (1, C_skip, Bt*Lp + 2P)    bf16  (per-element conv halo pre-padded)
    u_ref    : (Bt*L_in,   Bt*Lp + 2P)    bf16  (block-diag upsample+pad+halo matrix)
    wx_ref   : (C_out, K*C_in)            bf16  (im2col taps, BN scale folded in)
    ws_ref   : (C_out, K*C_skip)          bf16
    bias_ref : (C_out, 1)                 f32   (conv bias + eval BN folded)
    o_ref    : (1, C_out, Bt*Lp)          f32
    """
    c_in = x_ref.shape[1]
    k_taps = wx_ref.shape[1] // c_in
    n = o_ref.shape[2]

    # (1) linear upsample + align pad/crop + conv halo: ONE batched MXU matmul.
    xu = jnp.dot(x_ref[0], u_ref[...], preferred_element_type=jnp.float32)
    xu = xu.astype(jnp.bfloat16)                     # (C_in, n + 2P)
    sk = skip_ref[0]                                 # (C_skip, n + 2P)

    # (2) im2col: stack the K lane-shifted views along the sublane (channel) axis.
    x_cols = jnp.concatenate([xu[:, k:k + n] for k in range(k_taps)], axis=0)
    s_cols = jnp.concatenate([sk[:, k:k + n] for k in range(k_taps)], axis=0)

    # (3) Conv1d as two deep MXU matmuls (weights split -> no channel concat).
    acc = jnp.dot(wx_ref[...], x_cols, preferred_element_type=jnp.float32)
    acc = acc + jnp.dot(ws_ref[...], s_cols, preferred_element_type=jnp.float32)

    # (4) folded conv-bias + eval BatchNorm, then LeakyReLU(0.2) on the VPU.
    y = acc + bias_ref[...]
    o_ref[0] = jnp.where(y > 0, y, 0.2 * y).astype(o_ref.dtype)


def _upsample_pad_matrix(l_in, l_up, l_skip, halo):
    """(L_in, L_skip + 2*halo) matrix U with  x @ U == halo_pad(F.pad(upsample_linear(x))).

    Handles both positive F.pad (zero pad) and negative F.pad (crop), like PyTorch.
    """
    lp = l_skip + 2 * halo
    pad_left = (l_skip - l_up) // 2
    u = np.zeros((l_in, lp), dtype=np.float32)
    if l_up <= 1 or l_in == 1:
        src = np.zeros((max(l_up, 0),), dtype=np.float64)
    else:
        src = np.arange(l_up, dtype=np.float64) * (l_in - 1) / (l_up - 1)
    i0 = np.clip(np.floor(src).astype(np.int64), 0, l_in - 1)
    i1 = np.clip(i0 + 1, 0, l_in - 1)
    w1 = (src - i0).astype(np.float32)
    w0 = 1.0 - w1
    for j in range(l_up):
        col = pad_left + j
        if 0 <= col < l_skip:
            u[i0[j], halo + col] += w0[j]
            u[i1[j], halo + col] += w1[j]
    return u


def _step_vmem_bytes(bt, c_in, c_skip, c_out, l_in, lp, k_taps):
    """Rough per-grid-step VMEM footprint (double-buffered tiles + residents + temps)."""
    n = bt * lp
    nh = n + 2 * (k_taps // 2)
    x_t = c_in * bt * l_in * 2          # bf16 input tile
    s_t = c_skip * nh * 2               # bf16 skip tile
    o_t = c_out * n * 4                 # f32 output tile
    u_b = bt * l_in * nh * 2            # resident upsample matrix
    w_b = c_out * k_taps * (c_in + c_skip) * 2 + c_out * 4
    tmp = c_in * nh * 6 + k_taps * (c_in + c_skip) * n * 2 + c_out * n * 8
    return 2 * (x_t + s_t + o_t) + 2 * (u_b + w_b) + tmp


def _pick_bt(batch, c_in, c_skip, c_out, l_in, lp, k_taps,
             budget_bytes=40 * 1024 * 1024):
    """Largest batch tile fitting the VMEM budget; prefer an even-length grid
    (keeps both v7x TensorCores busy), then the largest tile (fewest serial steps)."""
    divisors = [d for d in range(1, batch + 1) if batch % d == 0]
    fitting = [d for d in divisors
               if _step_vmem_bytes(d, c_in, c_skip, c_out, l_in, lp, k_taps) <= budget_bytes]
    if not fitting:
        fitting = [1]
    even = [d for d in fitting if (batch // d) % 2 == 0]
    pool = even if even else fitting
    return max(pool)


def decoder_block(x, skip, conv_w, conv_b, bn_gamma, bn_beta, bn_mean, bn_var,
                  scale_factor, eps=1e-5):
    """x: (B, C_in, L_in); skip: (B, C_skip, L_skip); conv_w: (C_out, C_in+C_skip, K)."""
    B, C_in, L_in = x.shape
    _, C_skip, L_skip = skip.shape
    C_out, C_tot, K = conv_w.shape
    assert C_tot == C_in + C_skip
    P = K // 2                                   # Conv1d padding (module uses k=5, pad=2)
    Lp = L_skip + 2 * P                          # per-element conv-halo-padded length

    # ---- trace-time constant folding ---------------------------------------
    L_up = int(math.floor(L_in * scale_factor))
    u = _upsample_pad_matrix(L_in, L_up, L_skip, P)          # (L_in, Lp)

    scale = bn_gamma / jnp.sqrt(bn_var + eps)                # eval-mode BN scale
    w_eff = conv_w.astype(jnp.float32) * scale[:, None, None]
    bias = (bn_beta + scale * (conv_b - bn_mean)).reshape(C_out, 1).astype(jnp.float32)

    # split at the channel concat + fold the K taps into im2col layout: (C_out, K*C)
    w_x = jnp.transpose(w_eff[:, :C_in, :], (0, 2, 1)).reshape(C_out, K * C_in)
    w_s = jnp.transpose(w_eff[:, C_in:, :], (0, 2, 1)).reshape(C_out, K * C_skip)
    w_x = w_x.astype(jnp.bfloat16)
    w_s = w_s.astype(jnp.bfloat16)

    # ---- batch tiling: batch folded into the lane axis ----------------------
    Bt = _pick_bt(B, C_in, C_skip, C_out, L_in, Lp, K)
    G = B // Bt
    n = Bt * Lp                                  # merged lane width per grid step
    nh = n + 2 * P                               # trailing slack so every tap slice is width n

    u_blk = np.zeros((Bt * L_in, nh), dtype=np.float32)      # block-diag upsample matrix
    for b in range(Bt):
        u_blk[b * L_in:(b + 1) * L_in, b * Lp:(b + 1) * Lp] = u
    u_blk = jnp.asarray(u_blk, dtype=jnp.bfloat16)

    x_m = (x.reshape(G, Bt, C_in, L_in).transpose(0, 2, 1, 3)
             .reshape(G, C_in, Bt * L_in).astype(jnp.bfloat16))
    skip_p = jnp.pad(skip, ((0, 0), (0, 0), (P, P)))
    skip_m = (skip_p.reshape(G, Bt, C_skip, Lp).transpose(0, 2, 1, 3)
                    .reshape(G, C_skip, n))
    skip_m = jnp.pad(skip_m, ((0, 0), (0, 0), (0, 2 * P))).astype(jnp.bfloat16)

    step_bytes = _step_vmem_bytes(Bt, C_in, C_skip, C_out, L_in, Lp, K)
    vmem_limit = int(min(48 * 1024 * 1024, max(16 * 1024 * 1024, 4 * step_bytes)))

    flops = G * (2 * C_in * (Bt * L_in) * nh + 2 * C_out * K * C_tot * n)
    bytes_accessed = (2 * (x_m.size + skip_m.size + u_blk.size + w_x.size + w_s.size)
                      + 4 * bias.size + 4 * G * C_out * n)

    out_m = pl.pallas_call(
        decoder_block_kernel,
        out_shape=jax.ShapeDtypeStruct((G, C_out, n), jnp.float32),
        grid_spec=pltpu.PrefetchScalarGridSpec(
            num_scalar_prefetch=0,
            grid=(G,),
            in_specs=[
                pl.BlockSpec((1, C_in, Bt * L_in), lambda i: (i, 0, 0)),   # x tile
                pl.BlockSpec((1, C_skip, nh), lambda i: (i, 0, 0)),        # skip tile
                pl.BlockSpec((Bt * L_in, nh), lambda i: (0, 0)),           # upsample matrix
                pl.BlockSpec((C_out, K * C_in), lambda i: (0, 0)),         # x-part conv taps
                pl.BlockSpec((C_out, K * C_skip), lambda i: (0, 0)),       # skip-part conv taps
                pl.BlockSpec((C_out, 1), lambda i: (0, 0)),                # folded bias
            ],
            out_specs=pl.BlockSpec((1, C_out, n), lambda i: (i, 0, 0)),
        ),
        compiler_params=pltpu.CompilerParams(
            dimension_semantics=("parallel",),
            vmem_limit_bytes=vmem_limit,
        ),
        cost_estimate=pl.CostEstimate(
            flops=int(flops), transcendentals=0, bytes_accessed=int(bytes_accessed)),
    )(x_m, skip_m, u_blk, w_x, w_s, bias)

    out = (out_m.reshape(G, C_out, Bt, Lp).transpose(0, 2, 1, 3)
                .reshape(B, C_out, Lp)[:, :, :L_skip])
    return out.astype(x.dtype)


def reference(x, skip, conv_w, conv_b, gamma, beta, rmean, rvar, scale_factor, eps=1e-5):
    """Pure-JAX replica of the PyTorch forward (eval-mode BatchNorm)."""
    B, C_in, L_in = x.shape
    L_skip = skip.shape[-1]
    K = conv_w.shape[-1]
    P = K // 2
    L_up = int(math.floor(L_in * scale_factor))
    if L_up <= 1 or L_in == 1:
        src = jnp.zeros((L_up,), dtype=jnp.float32)
    else:
        src = jnp.arange(L_up, dtype=jnp.float32) * (L_in - 1) / (L_up - 1)
    i0 = jnp.clip(jnp.floor(src).astype(jnp.int32), 0, L_in - 1)
    i1 = jnp.clip(i0 + 1, 0, L_in - 1)
    w1 = src - i0.astype(jnp.float32)
    w0 = 1.0 - w1
    x_up = x[:, :, i0] * w0 + x[:, :, i1] * w1
    diff = L_skip - L_up
    pad_l, pad_r = diff // 2, diff - diff // 2
    if diff >= 0:
        x_up = jnp.pad(x_up, ((0, 0), (0, 0), (pad_l, pad_r)))
    else:                                        # negative F.pad = crop (PyTorch semantics)
        x_up = x_up[:, :, (-pad_l):(L_up + pad_r)]
    cat = jnp.concatenate([x_up, skip], axis=1)
    z = jax.lax.conv_general_dilated(cat, conv_w, window_strides=(1,),
                                     padding=[(P, P)],
                                     dimension_numbers=('NCH', 'OIH', 'NCH'))
    z = z + conv_b[None, :, None]
    z = gamma[None, :, None] * (z - rmean[None, :, None]) \
        / jnp.sqrt(rvar[None, :, None] + eps) + beta[None, :, None]
    return jnp.where(z > 0, z, 0.2 * z)


if __name__ == "__main__":
    B, C_in, C_skip, C_out = 4, 8, 8, 16
    L_in, scale_factor = 8, 2
    L_skip = 20                      # skip longer than upsampled x -> exercises F.pad

    key = jax.random.PRNGKey(0)
    kx, ks, kw, kb, kg, kbeta, km, kv = jax.random.split(key, 8)

    x = jax.random.normal(kx, (B, C_in, L_in), dtype=jnp.float32)
    skip = jax.random.normal(ks, (B, C_skip, L_skip), dtype=jnp.float32)
    conv_w = jax.random.normal(kw, (C_out, C_in + C_skip, 5), dtype=jnp.float32) * 0.1
    conv_b = jax.random.normal(kb, (C_out,), dtype=jnp.float32) * 0.1
    bn_gamma = 1.0 + 0.1 * jax.random.normal(kg, (C_out,), dtype=jnp.float32)
    bn_beta = 0.1 * jax.random.normal(kbeta, (C_out,), dtype=jnp.float32)
    bn_mean = 0.1 * jax.random.normal(km, (C_out,), dtype=jnp.float32)
    bn_var = jax.random.uniform(kv, (C_out,), dtype=jnp.float32,
                                minval=0.5, maxval=1.5)

    out = decoder_block(x, skip, conv_w, conv_b, bn_gamma, bn_beta, bn_mean, bn_var,
                        scale_factor)
    out = jax.block_until_ready(out)

    ref = reference(x, skip, conv_w, conv_b, bn_gamma, bn_beta, bn_mean, bn_var,
                    scale_factor)
    assert out.shape == (B, C_out, L_skip)
    # bf16 MXU operands with f32 accumulation -> modest tolerance vs the f32 reference.
    assert jnp.allclose(out, ref, atol=3e-2, rtol=3e-2), "mismatch vs reference"

    print("KERNEL_OK")
</pallas_src>

<mosaic_0001>
module attributes {stable_mosaic.version = 11 : i64} {
  func.func @decoder_block_kernel(%arg0: i32, %arg1: memref<1x8x16xbf16, #tpu.memory_space<vmem>>, %arg2: memref<1x8x52xbf16, #tpu.memory_space<vmem>>, %arg3: memref<16x52xbf16, #tpu.memory_space<vmem>>, %arg4: memref<16x40xbf16, #tpu.memory_space<vmem>>, %arg5: memref<16x40xbf16, #tpu.memory_space<vmem>>, %arg6: memref<16x1xf32, #tpu.memory_space<vmem>>, %arg7: memref<1x16x48xf32, #tpu.memory_space<vmem>>) attributes {dimension_semantics = [#tpu.dimension_semantics<parallel>], iteration_bounds = array<i64: 2>, scalar_prefetch = 0 : i64, scratch_operands = 0 : i64, tpu.core_type = #tpu.core_type<tc>, window_params = [{transform_indices = @transform_0, window_bounds = array<i64: 1, 8, 16>}, {transform_indices = @transform_1, window_bounds = array<i64: 1, 8, 52>}, {pipeline_mode = #tpu.pipeline_mode<synchronous>, transform_indices = @transform_2, window_bounds = array<i64: 16, 52>}, {pipeline_mode = #tpu.pipeline_mode<synchronous>, transform_indices = @transform_3, window_bounds = array<i64: 16, 40>}, {pipeline_mode = #tpu.pipeline_mode<synchronous>, transform_indices = @transform_4, window_bounds = array<i64: 16, 40>}, {pipeline_mode = #tpu.pipeline_mode<synchronous>, transform_indices = @transform_5, window_bounds = array<i64: 16, 1>}, {transform_indices = @transform_6, window_bounds = array<i64: 1, 16, 48>}]} {
    %c0 = arith.constant 0 : index
    %c0_0 = arith.constant 0 : index
    %c0_1 = arith.constant 0 : index
    %0 = vector.load %arg1[%c0, %c0_0, %c0_1] : memref<1x8x16xbf16, #tpu.memory_space<vmem>>, vector<1x8x16xbf16>
    %1 = vector.shape_cast %0 : vector<1x8x16xbf16> to vector<8x16xbf16>
    %c0_2 = arith.constant 0 : index
    %c0_3 = arith.constant 0 : index
    %2 = vector.load %arg3[%c0_2, %c0_3] : memref<16x52xbf16, #tpu.memory_space<vmem>>, vector<16x52xbf16>
    %cst = arith.constant dense<0.000000e+00> : vector<8x52xf32>
    %3 = tpu.matmul %1, %2, %cst {dimension_numbers = #tpu.dot_dimension_numbers<[1], [0], [0], [1], [0, 0, 1, 1], [], []>} : vector<8x16xbf16>, vector<16x52xbf16>, vector<8x52xf32> -> vector<8x52xf32>
    %4 = arith.truncf %3 : vector<8x52xf32> to vector<8x52xbf16>
    %c0_4 = arith.constant 0 : index
    %c0_5 = arith.constant 0 : index
    %c0_6 = arith.constant 0 : index
    %5 = vector.load %arg2[%c0_4, %c0_5, %c0_6] : memref<1x8x52xbf16, #tpu.memory_space<vmem>>, vector<1x8x52xbf16>
    %6 = vector.shape_cast %5 : vector<1x8x52xbf16> to vector<8x52xbf16>
    %7 = vector.extract_strided_slice %4 {offsets = [0, 0], sizes = [8, 48], strides = [1, 1]} : vector<8x52xbf16> to vector<8x48xbf16>
    %8 = vector.extract_strided_slice %4 {offsets = [0, 1], sizes = [8, 48], strides = [1, 1]} : vector<8x52xbf16> to vector<8x48xbf16>
    %9 = vector.extract_strided_slice %4 {offsets = [0, 2], sizes = [8, 48], strides = [1, 1]} : vector<8x52xbf16> to vector<8x48xbf16>
    %10 = vector.extract_strided_slice %4 {offsets = [0, 3], sizes = [8, 48], strides = [1, 1]} : vector<8x52xbf16> to vector<8x48xbf16>
    %11 = vector.extract_strided_slice %4 {offsets = [0, 4], sizes = [8, 48], strides = [1, 1]} : vector<8x52xbf16> to vector<8x48xbf16>
    %12 = tpu.concatenate %7, %8, %9, %10, %11 in 0 : vector<8x48xbf16>, vector<8x48xbf16>, vector<8x48xbf16>, vector<8x48xbf16>, vector<8x48xbf16> -> vector<40x48xbf16>
    %13 = vector.extract_strided_slice %6 {offsets = [0, 0], sizes = [8, 48], strides = [1, 1]} : vector<8x52xbf16> to vector<8x48xbf16>
    %14 = vector.extract_strided_slice %6 {offsets = [0, 1], sizes = [8, 48], strides = [1, 1]} : vector<8x52xbf16> to vector<8x48xbf16>
    %15 = vector.extract_strided_slice %6 {offsets = [0, 2], sizes = [8, 48], strides = [1, 1]} : vector<8x52xbf16> to vector<8x48xbf16>
    %16 = vector.extract_strided_slice %6 {offsets = [0, 3], sizes = [8, 48], strides = [1, 1]} : vector<8x52xbf16> to vector<8x48xbf16>
    %17 = vector.extract_strided_slice %6 {offsets = [0, 4], sizes = [8, 48], strides = [1, 1]} : vector<8x52xbf16> to vector<8x48xbf16>
    %18 = tpu.concatenate %13, %14, %15, %16, %17 in 0 : vector<8x48xbf16>, vector<8x48xbf16>, vector<8x48xbf16>, vector<8x48xbf16>, vector<8x48xbf16> -> vector<40x48xbf16>
    %c0_7 = arith.constant 0 : index
    %c0_8 = arith.constant 0 : index
    %19 = vector.load %arg4[%c0_7, %c0_8] : memref<16x40xbf16, #tpu.memory_space<vmem>>, vector<16x40xbf16>
    %cst_9 = arith.constant dense<0.000000e+00> : vector<16x48xf32>
    %20 = tpu.matmul %19, %12, %cst_9 {dimension_numbers = #tpu.dot_dimension_numbers<[1], [0], [0], [1], [0, 0, 1, 1], [], []>} : vector<16x40xbf16>, vector<40x48xbf16>, vector<16x48xf32> -> vector<16x48xf32>
    %c0_10 = arith.constant 0 : index
    %c0_11 = arith.constant 0 : index
    %21 = vector.load %arg5[%c0_10, %c0_11] : memref<16x40xbf16, #tpu.memory_space<vmem>>, vector<16x40xbf16>
    %cst_12 = arith.constant dense<0.000000e+00> : vector<16x48xf32>
    %22 = tpu.matmul %21, %18, %cst_12 {dimension_numbers = #tpu.dot_dimension_numbers<[1], [0], [0], [1], [0, 0, 1, 1], [], []>} : vector<16x40xbf16>, vector<40x48xbf16>, vector<16x48xf32> -> vector<16x48xf32>
    %23 = arith.addf %20, %22 : vector<16x48xf32>
    %c0_13 = arith.constant 0 : index
    %c0_14 = arith.constant 0 : index
    %24 = vector.load %arg6[%c0_13, %c0_14] : memref<16x1xf32, #tpu.memory_space<vmem>>, vector<16x1xf32>
    %25 = vector.broadcast %24 : vector<16x1xf32> to vector<16x48xf32>
    %26 = arith.addf %23, %25 : vector<16x48xf32>
    %cst_15 = arith.constant 0.000000e+00 : f32
    %27 = vector.broadcast %cst_15 : f32 to vector<16x48xf32>
    %28 = arith.cmpf ogt, %26, %27 : vector<16x48xf32>
    %cst_16 = arith.constant 2.000000e-01 : f32
    %29 = vector.broadcast %cst_16 : f32 to vector<16x48xf32>
    %30 = arith.mulf %29, %26 : vector<16x48xf32>
    %31 = arith.select %28, %26, %30 : vector<16x48xi1>, vector<16x48xf32>
    %c0_17 = arith.constant 0 : index
    %c0_18 = arith.constant 0 : index
    %c0_19 = arith.constant 0 : index
    %32 = vector.load %arg7[%c0_17, %c0_18, %c0_19] : memref<1x16x48xf32, #tpu.memory_space<vmem>>, vector<1x16x48xf32>
    %33 = vector.shape_cast %32 : vector<1x16x48xf32> to vector<16x48xf32>
    %34 = vector.shape_cast %31 : vector<16x48xf32> to vector<1x16x48xf32>
    tpu.vector_store %arg7[%c0_17, %c0_18, %c0_19], %34 {strides = array<i32>} : memref<1x16x48xf32, #tpu.memory_space<vmem>>, vector<1x16x48xf32>,
    return
  }
  func.func @transform_0(%arg0: i32) -> (i32, i32, i32) {
    %c0_i32 = arith.constant 0 : i32
    %c0_i32_0 = arith.constant 0 : i32
    %c0_i32_1 = arith.constant 0 : i32
    return %arg0, %c0_i32, %c0_i32_0 : i32, i32, i32
  }
  func.func @transform_1(%arg0: i32) -> (i32, i32, i32) {
    %c0_i32 = arith.constant 0 : i32
    %c0_i32_0 = arith.constant 0 : i32
    %c0_i32_1 = arith.constant 0 : i32
    return %arg0, %c0_i32, %c0_i32_0 : i32, i32, i32
  }
  func.func @transform_2(%arg0: i32) -> (i32, i32) {
    %c0_i32 = arith.constant 0 : i32
    %c0_i32_0 = arith.constant 0 : i32
    %c0_i32_1 = arith.constant 0 : i32
    return %c0_i32, %c0_i32_0 : i32, i32
  }
  func.func @transform_3(%arg0: i32) -> (i32, i32) {
    %c0_i32 = arith.constant 0 : i32
    %c0_i32_0 = arith.constant 0 : i32
    %c0_i32_1 = arith.constant 0 : i32
    return %c0_i32, %c0_i32_0 : i32, i32
  }
  func.func @transform_4(%arg0: i32) -> (i32, i32) {
    %c0_i32 = arith.constant 0 : i32
    %c0_i32_0 = arith.constant 0 : i32
    %c0_i32_1 = arith.constant 0 : i32
    return %c0_i32, %c0_i32_0 : i32, i32
  }
  func.func @transform_5(%arg0: i32) -> (i32, i32) {
    %c0_i32 = arith.constant 0 : i32
    %c0_i32_0 = arith.constant 0 : i32
    %c0_i32_1 = arith.constant 0 : i32
    return %c0_i32, %c0_i32_0 : i32, i32
  }
  func.func @transform_6(%arg0: i32) -> (i32, i32, i32) {
    %c0_i32 = arith.constant 0 : i32
    %c0_i32_0 = arith.constant 0 : i32
    %c0_i32_1 = arith.constant 0 : i32
    return %arg0, %c0_i32, %c0_i32_0 : i32, i32, i32
  }
}

</mosaic_0001>

<bundles_post_ra>
// kernel: tpu_custom_call.1
= control target key start
LH: loop header
LB: loop body
LE: loop exit
PB: predicated region body
PF: predicated region fallthrough
CT: control target
= control target key end

     0   :  { %11 = vsyncpa [#allocation3], 0  ;;  %s1048_s0 = inlined_call_operand.vmem [shape: bf16[2,8,16], index: 0, kind: input, shape index: {}]   ;;  %s1049_s1 = inlined_call_operand.vmem [shape: bf16[2,8,52], index: 1, kind: input, shape index: {}]   ;;  %s1050_s2 = inlined_call_operand.hbm [shape: bf16[16,52], index: 2, kind: input, shape index: {}]   ;;  %s1051_s3 = inlined_call_operand.hbm [shape: bf16[16,40], index: 3, kind: input, shape index: {}]   ;;  %s1052_s4 = inlined_call_operand.hbm [shape: bf16[16,40], index: 4, kind: input, shape index: {}]   ;;  %s1053_s5 = inlined_call_operand.vmem [shape: f32[16,1], index: 5, kind: input, shape index: {}]   ;;  %s1054_s6 = inlined_call_operand.hbm [shape: f32[2,16,48], index: 6, kind: output, shape index: {}]  }
   0x1   :  { %12 = vsyncpa [#allocation6], 0 }
   0x2   :  { %13 = vsyncpa [#allocation4], 0 }
   0x3   :  { %15 = vsyncpa [#allocation4 + $0x1], 0  ;;  %s908_s21 = smov 0   ;;  %s910_s22 = smov 0  }
   0x4   :  { %s912_s23 = smov 0   ;;  %s914_s24 = smov 0  }
   0x5 LB: > { %s929_s25 = sadd.s32 4294967295, %s859_s24   ;;  %s581_s26 = sadd.s32 4294967294, %s859_s24   ;;  %s859_s24 = sphi %s914_s24, %s1062_s24   ;;  %s855_s23 = sphi %s912_s23, %s1061_s23   ;;  %s851_s22 = sphi %s910_s22, %s1060_s22   ;;  %s847_s21 = sphi %s908_s21, %s1059_s21  }
   0x6   : > { %s933_s27 = sadd.s32 1, %s859_s24   ;;  %s164_s28 = sadd.s32 1, %s855_s23 }
   0x7   : > { %s161_s29 = ssub.s32 %s859_s24, %s933_s27  ;;  %p174_p0 = scmp.ne.s32.totalorder %s855_s23, %s851_s22 }
   0x8   : > { %p162_p1 = scmp.eq.s32.totalorder %s161_s29, 0  ;;  %p175_p2 = scmp.eq.s32.totalorder %s929_s25, 1 }
   0x9   : > { %p180_p3 = scmp.ne.s32.totalorder %s851_s22, %s847_s21  ;;  %p181_p4 = scmp.eq.s32.totalorder %s581_s26, 1 }
   0xa   : > { %s944_s30 = scalar_select %p162_p1, %s855_s23, %s164_s28  }
   0xb   : > { %p946_p5 = por %p175_p2, %p174_p0  ;;  %p950_p6 = por %p181_p4, %p180_p3 }
   0xc   : > { %p582_p7 = scmp.ge.s32.totalorder %s859_s24, 1  ;;  %p188_p8 = scmp.lt.s32.totalorder %s859_s24, 3 }
   0xd   : > { %p646_p9 = scmp.eq.s32.totalorder %s929_s25, 0  ;;  %s213_s12 = sshll.u32 %s1051_s3, 4  ;;  %s214_s12 = int_to_ptr.hbm [resolvable:$true] %s213_s12 }
   0xe   : > { %p957_p10 = pnand %p582_p7, %p188_p8  ;;  %s199_s15 = sshll.u32 %s1050_s2, 4  ;;  %s200_s15 = int_to_ptr.hbm [resolvable:$true] %s199_s15 }
   0xf   : > { %s861_s17 = smov [#allocation5]   ;;  %s862_s19 = smov 64  }
  0x10   : > { %p632_p11 = pneg %p957_p10  ;;  %s215_s18 = sshll.u32 %s861_s17, 4  ;;  %s216_s18 = int_to_ptr.vmem [resolvable:$true] %s215_s18 }
  0x11   : > { %s863_s20 = smov 4   ;;  %s864_s26 = smov [#allocation2]  }
  0x12   : > { %p971_p12 = pnand %p646_p9, %p632_p11  ;;  %s201_s28 = sshll.u32 %s864_s26, 4  ;;  %s202_s28 = int_to_ptr.vmem [resolvable:$true] %s201_s28 }
  0x13   : > { %s227_s11 = sshll.u32 %s1052_s4, 4  ;;  %s865_s13 = smov [#allocation7]   ;;  %s228_s11 = int_to_ptr.hbm [resolvable:$true] %s227_s11 }
  0x14   : > { %638 = dma.hbm_to_vmem [thread:$0]  (!%p971_p12), %s214_s12, 128, %s216_s18, [#allocation6], %s862_s19, %s862_s19, %s863_s20  }
  0x15   : > { %635 = dma.hbm_to_vmem [thread:$0]  (!%p971_p12), %s200_s15, 128, %s202_s28, [#allocation3], %s862_s19, %s862_s19, %s863_s20  }
  0x16   : > { %s229_s14 = sshll.u32 %s865_s13, 4  ;;  %262 = sbr.rel (%p957_p10) target bundleno = 454 (0x1c6), region = 44  ;;  %s230_s14 = int_to_ptr.vmem [resolvable:$true] %s229_s14 }
  0x17   : > { %641 = dma.hbm_to_vmem [thread:$0]  (!%p971_p12), %s228_s11, 128, %s230_s14, [#allocation6], %s862_s19, %s862_s19, %s863_s20  }
  0x1b   : > { %834 = dma.done.wait (%p646_p9), [#allocation3], 128  }
  0x1c   : > { %836 = vsyncadd (%p646_p9), [#allocation3], 4294967168 }
  0x1d   : > { %838 = dma.done.wait (%p646_p9), [#allocation6], 256  }
  0x1e   : > { %840 = vsyncadd (%p646_p9), [#allocation6], 4294967040  ;;  %p306_p13 = scmp.lt.s32.totalorder %s929_s25, 1  ;;  %v614_v0 = vld [vmem:[#allocation2] sm:$0xff]  ;;  %vm324_vm0 = vcmask 130048   ;;  %s866_s26 = smov 127  }
  0x1f   : > { %335 = vmatpush.bf16.msra.mxu0 %v614_v0  ;;  %s867_s28 = smov 125   ;;  %s868_s29 = smov 124   ;;  %v438_v10 = vld [vmem:[%s1053_s5 + $0x8] sm:$0xff]  ;;  %v437_v11 = vld [vmem:[%s1053_s5] sm:$0xff]  ;;  %v870_v12 = vmov 0   ;;  %vm354_vm1 = vcmask 1043456  }
  0x20   : > { %s307_s12 = scalar_select %p306_p13, %s929_s25, 1  ;;  %698 = vset.pattern.permute.xlu0 %v870_v12  ;;  %697 = vset.pattern.permute.xlu2 %v870_v12  ;;  %v615_v22 = vld [vmem:[#allocation5] sm:$0xff]  ;;  %vm391_vm2 = vcmask 326656   ;;  %v616_v28 = vld [vmem:[#allocation7] sm:$0xff]  ;;  %vm457_vm3 = vcmask 392192  }
  0x21   : > { %s869_s10 = smov 126   ;;  %s617_s9 = sshll.u32 %s929_s25, 4 }
  0x22   : > { %s592_s15 = sshll.u32 %s307_s12, 2  ;;  %s472_s19 = scalar_lea.hbm %s1054_s6, %s617_s9 }
  0x23   : > { %s309_s17 = scalar_lea.vmem %s1048_s0, %s592_s15  ;;  %s313_s20 = scalar_lea.vmem %s1049_s1, %s592_s15 }
  0x24   : > { %v315_v1 = vld [vmem:[%s309_s17] sm:$0xf]  ;;  %s303_s15 = sand.u32 1, %s851_s22   ;;  %s809_s14 = scalar_lea.hbm %s1054_s6, 32 }
  0x25   : > { %598 = vmatmul.msk.bf16.vlgmr.msra.gmra.mxu0 %vm324_vm0, %v315_v1  ;;  %v342_v5 = vld [vmem:[%s313_s20] sm:$0xf]  ;;  %s591_s16 = sshll.u32 %s303_s15, 4  ;;  %s461_s25 = scalar_lea.sflag [#allocation4], %s303_s15 }
  0x26   : > { %v364_v7 = vunpack.c.l.b16 %v342_v5  ;;  %s305_s20 = scalar_lea.vmem [#allocation8], %s591_s16 }
  0x28   : > { %v365_v9 = vpack.c.b16 %v364_v7, %v364_v7 }
  0xa2   : > { %v337_v2 = vpop.f32.mrf.mxu0 }
  0xa3   : > { %v341_v3 = vpack.c.bf16 %v337_v2, %v337_v2 }
  0xa5   : > { %v344_v4 = vunpack.c.l.b16 %v341_v3 }
  0xa7   : > { %v345_v6 = vpack.c.b16 %v344_v4, %v344_v4 }
  0xa9   : > { %346 = vrot.lane.b32.xlu2 %v345_v6, %s866_s26  ;;  %350 = vrot.lane.b32.xlu1 %v345_v6, %s867_s28 }
  0xaa   : > { %352 = vrot.lane.b32.xlu0 %v345_v6, %s868_s29  ;;  %v339_v8 = vpop.f32.mrf.mxu0 }
  0xb1   : > { %372 = vrot.lane.b32.xlu1 %v365_v9, %s868_s29  ;;  %368 = vrot.lane.b32.xlu2 %v365_v9, %s869_s10 }
  0xb2   : > { %348 = vrot.lane.b32.xlu0 %v345_v6, %s869_s10 }
  0xb9   : > { %366 = vrot.lane.b32.xlu1 %v365_v9, %s866_s26  ;;  %441 = vperm.xlu2 %697, %v437_v11   ;;  %s473_s26 = sshll.u32 %s305_s20, 4  ;;  %s474_s26 = int_to_ptr.vmem [resolvable:$true] %s473_s26 }
  0xba   : > { %370 = vrot.lane.b32.xlu0 %v365_v9, %s867_s28  ;;  %s475_s28 = sshll.u32 %s472_s19, 4  ;;  %s476_s28 = int_to_ptr.hbm [resolvable:$true] %s475_s28 }
  0xbb   : > { %s803_s29 = sshra.s32 %s476_s28, 4  ;;  %s804_s29 = int_to_ptr.hbm [resolvable:$true] %s803_s29 }
  0xbc   : > { %s805_s10 = scalar_lea.hbm %s804_s29, 16  ;;  %p810_p3 = scmp.lt.s32.totalorder %s804_s29, %s1054_s6 }
  0xbd   : > { %p806_p0 = scmp.ne.s32.totalorder %s804_s29, %s805_s10  ;;  %p811_p4 = scmp.lt.s32.totalorder %s809_s14, %s805_s10 }
  0xbf   : > { %p807_p1 = pnand %p806_p0, %p946_p5  ;;  %p812_p7 = por %p811_p4, %p810_p3 }
  0xc1   : > { %p808_p2 = pneg %p807_p1 }
  0xc2   : > { %446 = vperm.xlu0 %698, %v438_v10  }
  0xc3   : > { %p813_p8 = pnand %p812_p7, %p808_p2 }
 0x103   : > { %v347_v16 = vpop.permute.xlu2 %346 }
 0x104   : > { %v357_v21 = vsel %vm354_vm1, %v341_v3, %v347_v16 }
 0x10b   : > { %v369_v23 = vpop.permute.xlu2 %368 }
 0x113   : > { %v442_v31 = vpop.permute.xlu2 %441 }
 0x11b   : > { %v351_v13 = vpop.permute.xlu1 %350 }
 0x11c   : > { %v353_v14 = vpop.permute.xlu0 %352 }
 0x11d   : > { %v421_v15 = vsel %vm354_vm1, %v353_v14, 0 }
 0x11e   : > { %428 = vmatpush.bf16.msra.mxu2 %v421_v15 }
 0x123   : > { %v373_v17 = vpop.permute.xlu1 %372 }
 0x124   : > { %v349_v18 = vpop.permute.xlu0 %348  ;;  %v396_v19 = vsel %vm354_vm1, %v373_v17, 0 }
 0x125   : > { %v361_v20 = vsel %vm354_vm1, %v349_v18, %v351_v13  ;;  %403 = vmatpush.bf16.msra.mxu1 %v396_v19 }
 0x126   : > { %429 = vmatpush.bf16.msra.mxu2 %v361_v20 }
 0x12a   : > { %430 = vmatpush.bf16.msra.mxu2 %v357_v21 }
 0x12b   : > { %v367_v25 = vpop.permute.xlu1 %366 }
 0x12c   : > { %v371_v24 = vpop.permute.xlu0 %370  ;;  %v376_v27 = vsel %vm354_vm1, %v342_v5, %v367_v25 }
 0x12d   : > { %608 = vmatmul.msk.bf16.vlgmr.msra.gmra.mxu2 %vm391_vm2, %v615_v22  ;;  %v380_v26 = vsel %vm354_vm1, %v369_v23, %v371_v24 }
 0x12e   : > { %404 = vmatpush.bf16.msra.mxu1 %v380_v26 }
 0x132   : > { %405 = vmatpush.bf16.msra.mxu1 %v376_v27 }
 0x134   : > { %v447_v36 = vpop.permute.xlu0 %446 }
 0x135   : > { %603 = vmatmul.msk.bf16.vlgmr.msra.gmra.mxu1 %vm391_vm2, %v616_v28 }
 0x1b0   : > { %v432_v29 = vpop.f32.mrf.mxu2 }
 0x1b2   : > { %v407_v30 = vpop.f32.mrf.mxu1 }
 0x1b3   : > { %v433_v32 = vadd.f32 %v432_v29, %v407_v30 }
 0x1b5   : > { %v449_v33 = vadd.f32 %v442_v31, %v433_v32 }
 0x1b7   : > { %vm451_vm4 = vcmp.gt.f32.partialorder %v449_v33, 0.0  ;;  %v453_v34 = vmul.f32 0.2, %v449_v33 }
 0x1b8   : > { %v434_v37 = vpop.f32.mrf.mxu2 }
 0x1b9   : > { %v455_v35 = vsel %vm451_vm4, %v449_v33, %v453_v34 }
 0x1ba   : > { %458 = vst.msk [vmem:[%s305_s20] sm:$0xff] %vm457_vm3, %v455_v35  ;;  %v409_v38 = vpop.f32.mrf.mxu1 }
 0x1bb   : > { %v435_v39 = vadd.f32 %v434_v37, %v409_v38 }
 0x1bd   : > { %v450_v40 = vadd.f32 %v447_v36, %v435_v39 }
 0x1bf   : > { %vm452_vm5 = vcmp.gt.f32.partialorder %v450_v40, 0.0  ;;  %v454_v41 = vmul.f32 0.2, %v450_v40 }
 0x1c1   : > { %v456_v42 = vsel %vm452_vm5, %v450_v40, %v454_v41 }
 0x1c2   : > { %459 = vst.msk [vmem:[%s305_s20 + $0x8] sm:$0xff] %vm457_vm3, %v456_v42 }
 0x1c3   : > { %816 = shalt.err (!%p813_p8)
}
 0x1c4   : > { %s871_s15 = smov 128   ;;  %s872_s9 = smov 8  }
 0x1c5   : > { %630 = dma.vmem_to_hbm [thread:$0]  (%p946_p5), %s474_s26, 256, %s476_s28, %s461_s25, %s871_s15, %s871_s15, %s872_s9  }
 0x1c6 PF: > { %p652_p9 = scmp.ge.s32.totalorder %s859_s24, 2  ;;  %s490_s17 = sand.u32 1, %s847_s21  }
 0x1c7   : > { %s491_s18 = scalar_lea.sflag [#allocation4], %s490_s17 }
 0x1c8   : > { %p643_p10 = pnand %p652_p9, %p950_p6 }
 0x1ca   : > { %p644_p11 = pneg %p643_p10 }
 0x1cc   : > { %842 = dma.done.wait (%p644_p11), %s491_s18, 256  }
 0x1cd   : > { %844 = vsyncadd (%p644_p11), %s491_s18, 4294967040  ;;  %p18_p12 = scmp.ge.s32.totalorder %s933_s27, 4   ;;  %s1059_s21 = smov %s851_s22 }
 0x1ce   : > { %s1060_s22 = smov %s855_s23  ;;  %s1061_s23 = smov %s944_s30 }
 0x1cf   : > { %s1062_s24 = smov %s933_s27  ;;  %20 = sbr.rel (!%p18_p12) target bundleno = 5 (0x5), region = 95 }
 0x1d4   :  { %497 = vsyncpa [#allocation3], 1 }
 0x1d5   :  { %499 = vsyncpa [#allocation3 + $0x1], 1 }
 0x1d6   :  { %500 = vsyncpa [#allocation6], 1 }
 0x1d7   :  { %501 = vsyncpa [#allocation4], 1 }
 0x1d8   :  { %503 = vsyncpa [#allocation4 + $0x1], 1 }

</bundles_post_ra>
